<compile_context>
chip_gen: v6e
topology: v6e:2x2x1
jax: 0.10.0
libtpu: 0.0.40
codegen_flags: <defaults>
</compile_context>

<pallas_src>
import math

import jax
import jax.numpy as jnp
import numpy as np
from jax.experimental import pallas as pl
from jax.experimental.pallas import tpu as pltpu

EPS = 1e-12  # matches torch.nn.functional.normalize default eps


def _round_up(a, b):
    return (a + b - 1) // b * b


def _align_lane(n):
    """Lane-dim alignment: prefer 256 (full v6e/v7x MXU width) unless the extra
    padding over plain 128-alignment exceeds ~25%."""
    n128 = _round_up(max(n, 1), 128)
    n256 = _round_up(max(n, 1), 256)
    return n256 if n256 * 4 <= n128 * 5 else n128


def _tpu_vmem_bytes():
    try:
        return int(pltpu.get_tpu_info().vmem_capacity_bytes)
    except Exception:
        return 64 * 1024 * 1024  # conservative default (v7x per-core VMEM)


def _pick_tiles(B, K, Dp, Cp, vmem_bytes):
    """Generation-aware (tb, tk, pipeline depth) selection from a VMEM budget."""
    budget = int(vmem_bytes * 0.55)                       # headroom for compiler scratch
    n_buf = 3 if vmem_bytes >= 96 * 1024 * 1024 else 2    # deeper pipeline on v5e/v6e
    Bp0 = _round_up(B, 8)
    tb_cands, tk_cands = [], []
    for t in (512, 256, 128, 64, 32, 16, 8):
        c = min(t, Bp0)
        if c not in tb_cands:
            tb_cands.append(c)
    for t in (2048, 1024, 512, 256):
        c = min(t, _round_up(K, 256))
        if c not in tk_cands:
            tk_cands.append(c)
    for tb in tb_cands:            # largest tb first: backbone-weight re-streaming ~ 1/tb
        for tk in tk_cands:        # largest tk first: fewer grid steps, bigger DMA bursts
            use = (n_buf * tb * tk * 2        # x tiles (bf16)
                   + n_buf * tk * Dp * 2      # streamed backbone-weight tiles (bf16)
                   + 2 * Dp * Cp * 2          # resident head weight (bf16)
                   + 2 * tb * Cp * 4          # output tile (f32)
                   + tb * Dp * 4)             # f32 feature accumulator scratch
            if use <= budget:
                return tb, tk, n_buf
    return tb_cands[-1], tk_cands[-1], 2


def model_with_head_kernel(x_ref, wbt_ref, wht_ref, o_ref, acc_ref):
    """Fused backbone projection + CosineLinear head, K-tiled.

    x_ref:   (tb, tk)  flattened input pixels, bf16                  (VMEM, streamed)
    wbt_ref: (tk, Dp)  backbone projection weight (pre-T), bf16      (VMEM, streamed)
    wht_ref: (Dp, Cp)  pre-normalized head weight * sigma, bf16,
                       pre-transposed to (in, out)                   (VMEM, resident)
    o_ref:   (tb, Cp)  logits, f32                                   (VMEM)
    acc_ref: (tb, Dp)  f32 feature accumulator                       (VMEM scratch)
    """
    k = pl.program_id(1)

    @pl.when(k == 0)
    def _init():
        acc_ref[...] = jnp.zeros_like(acc_ref)

    # Backbone stand-in: bf16 MXU matmul, f32 accumulation over K tiles.
    acc_ref[...] += jnp.dot(
        x_ref[...], wbt_ref[...], preferred_element_type=jnp.float32
    )

    @pl.when(k == pl.num_programs(1) - 1)
    def _finalize():
        feat = acc_ref[...]                                      # (tb, Dp) f32
        # Head matmul in natural (M,K)@(K,N) layout.  The weight was
        # L2-normalized, sigma-scaled and transposed once in the wrapper,
        # so no per-batch-tile normalization work remains here.
        out = jnp.dot(
            feat, wht_ref[...].astype(jnp.float32),
            preferred_element_type=jnp.float32,
        )                                                        # (tb, Cp)
        # F.normalize(feat, dim=1) applied as a per-row scale on the small
        # output tile; 1/max(||x||, eps) == rsqrt(max(sum_sq, eps^2)) (EUP).
        f_inv = jax.lax.rsqrt(
            jnp.maximum(jnp.sum(feat * feat, axis=-1, keepdims=True), EPS * EPS)
        )                                                        # (tb, 1)
        o_ref[...] = out * f_inv


def build_model_with_head(wb, wh, sigma, x_shape, *, tb=None, tk=None):
    """One-time setup (tile selection + weight prep).  Returns forward(x)."""
    B = int(x_shape[0])
    K = int(np.prod(x_shape[1:]))
    D, C = wb.shape[0], wh.shape[0]
    assert wb.shape == (D, K) and wh.shape == (C, D)

    Dp = _align_lane(D)
    Cp = _align_lane(C)

    vmem_bytes = _tpu_vmem_bytes()
    tb_a, tk_a, n_buf = _pick_tiles(B, K, Dp, Cp, vmem_bytes)
    tb = tb_a if tb is None else tb
    tk = tk_a if tk is None else tk
    Bp = _round_up(B, tb)
    Kp = _round_up(K, tk)

    # --- one-time weight prep (hoisted out of the per-call / per-tile path) ---
    # Backbone weight: cast to bf16 FIRST (no full-size f32 pad temp), T, pad.
    wbt_p = jnp.pad(wb.astype(jnp.bfloat16).T, ((0, Kp - K), (0, Dp - D)))
    # Head weight: F.normalize(weight, dim=1) in f32, fold sigma, transpose to
    # (in, out), cast to bf16, pad.
    wn = wh.astype(jnp.float32)
    wn = wn / jnp.maximum(jnp.linalg.norm(wn, axis=1, keepdims=True), EPS)
    wht_p = jnp.pad((wn * sigma[0]).T.astype(jnp.bfloat16),
                    ((0, Dp - D), (0, Cp - C)))

    # Deeper input pipeline only where VMEM is plentiful (v5e/v6e, 128 MiB).
    stream_kwargs = {"pipeline_mode": pl.Buffered(n_buf)} if n_buf != 2 else {}

    grid = (Bp // tb, Kp // tk)                     # (batch tiles, K tiles)
    grid_spec = pltpu.PrefetchScalarGridSpec(
        num_scalar_prefetch=0,
        grid=grid,
        in_specs=[
            pl.BlockSpec((tb, tk), lambda i, k: (i, k), **stream_kwargs),  # x
            pl.BlockSpec((tk, Dp), lambda i, k: (k, 0), **stream_kwargs),  # wbt
            pl.BlockSpec((Dp, Cp), lambda i, k: (0, 0)),                   # head weight
        ],
        out_specs=pl.BlockSpec((tb, Cp), lambda i, k: (i, 0)),
        scratch_shapes=[pltpu.VMEM((tb, Dp), jnp.float32)],
    )

    call = pl.pallas_call(
        model_with_head_kernel,
        out_shape=jax.ShapeDtypeStruct((Bp, Cp), jnp.float32),
        grid_spec=grid_spec,
        compiler_params=pltpu.CompilerParams(
            dimension_semantics=("parallel", "arbitrary"),
            # ~48 MiB on v7x (64 MiB physical), ~96-100 MiB on v5e/v6e (128 MiB).
            vmem_limit_bytes=int(min(vmem_bytes * 3 // 4, 100 * 1024 * 1024)),
        ),
    )

    # TODO(synk): on v7x (2 TensorCores) with a single batch tile the second
    # core idles; when compute-bound, split the K reduction across cores with
    # per-core partial accumulators instead of splitting the batch (which
    # would double the backbone-weight HBM traffic).

    @jax.jit
    def _forward(x_nchw, wbt, wht):
        # Cast to bf16 BEFORE padding (halves the HBM traffic of the pad temp).
        x_flat = x_nchw.reshape(B, K).astype(jnp.bfloat16)
        x_p = jnp.pad(x_flat, ((0, Bp - B), (0, Kp - K)))
        out_p = call(x_p, wbt, wht)
        return out_p[:B, :C]

    def forward(x_nchw):
        return _forward(x_nchw, wbt_p, wht_p)

    return forward


def reference(x_nchw, wb, wh, sigma):
    """Pure-JAX reference mirroring the kernel's mixed precision
    (bf16 backbone-matmul inputs, bf16 head weight, f32 accumulation/norms)."""
    B = x_nchw.shape[0]
    x = x_nchw.reshape(B, -1).astype(jnp.bfloat16).astype(jnp.float32)
    w = wb.astype(jnp.bfloat16).astype(jnp.float32)
    feat = jnp.dot(x, w.T, precision=jax.lax.Precision.HIGHEST)
    f_inv = 1.0 / jnp.maximum(jnp.linalg.norm(feat, axis=1, keepdims=True), EPS)
    wn = wh / jnp.maximum(jnp.linalg.norm(wh, axis=1, keepdims=True), EPS)
    wn = (wn * sigma[0]).astype(jnp.bfloat16).astype(jnp.float32)
    return jnp.dot(feat, wn.T, precision=jax.lax.Precision.HIGHEST) * f_inv


if __name__ == "__main__":
    # Small shapes consistent with the module's forward: NCHW image input,
    # backbone feature dim D, num_classes for the cosine head.
    B, C_in, H, W = 2, 4, 16, 16
    D = 32            # backbone output feature dim ("dim" probed in __init__)
    NUM_CLASSES = 10
    K = C_in * H * W  # 1024

    key = jax.random.PRNGKey(0)
    k_x, k_wb, k_wh = jax.random.split(key, 3)

    x = jax.random.normal(k_x, (B, C_in, H, W), dtype=jnp.float32)

    # Backbone stand-in weight (deterministic).
    wb = jax.random.normal(k_wb, (D, K), dtype=jnp.float32) * (1.0 / math.sqrt(K))

    # CosineLinear.reset_parameters(): uniform(-stdv, stdv), sigma = 1.
    stdv = 1.0 / math.sqrt(D)
    wh = jax.random.uniform(
        k_wh, (NUM_CLASSES, D), dtype=jnp.float32, minval=-stdv, maxval=stdv
    )
    sigma = jnp.ones((1,), dtype=jnp.float32)

    ref = jax.block_until_ready(reference(x, wb, wh, sigma))

    # Auto tile selection (at K=1024 this yields a single K tile).
    fwd_auto = build_model_with_head(wb, wh, sigma, x.shape)
    out_auto = jax.block_until_ready(fwd_auto(x))
    assert out_auto.shape == (B, NUM_CLASSES)
    np.testing.assert_allclose(np.asarray(out_auto), np.asarray(ref),
                               rtol=2e-3, atol=2e-3)

    # Forced tk=512 -> two K tiles, exercising the accumulator init/finalize path.
    fwd_k2 = build_model_with_head(wb, wh, sigma, x.shape, tk=512)
    out_k2 = jax.block_until_ready(fwd_k2(x))
    np.testing.assert_allclose(np.asarray(out_k2), np.asarray(ref),
                               rtol=2e-3, atol=2e-3)

    print("KERNEL_OK")
</pallas_src>

<mosaic_0001>
module attributes {stable_mosaic.version = 11 : i64} {
  func.func @model_with_head_kernel(%arg0: i32, %arg1: i32, %arg2: memref<8x1024xbf16, #tpu.memory_space<vmem>>, %arg3: memref<1024x128xbf16, #tpu.memory_space<vmem>>, %arg4: memref<128x128xbf16, #tpu.memory_space<vmem>>, %arg5: memref<8x128xf32, #tpu.memory_space<vmem>>, %arg6: memref<8x128xf32, #tpu.memory_space<vmem>>) attributes {dimension_semantics = [#tpu.dimension_semantics<parallel>, #tpu.dimension_semantics<arbitrary>], iteration_bounds = array<i64: 1, 1>, scalar_prefetch = 0 : i64, scratch_operands = 1 : i64, tpu.core_type = #tpu.core_type<tc>, window_params = [{transform_indices = @transform_0, window_bounds = array<i64: 8, 1024>}, {transform_indices = @transform_1, window_bounds = array<i64: 1024, 128>}, {pipeline_mode = #tpu.pipeline_mode<synchronous>, transform_indices = @transform_2, window_bounds = array<i64: 128, 128>}, {transform_indices = @transform_3, window_bounds = array<i64: 8, 128>}]} {
    %c0_i32 = arith.constant 0 : i32
    %0 = arith.cmpi eq, %arg1, %c0_i32 : i32
    %1 = arith.extui %0 : i1 to i32
    %c0_i32_0 = arith.constant 0 : i32
    %2 = arith.cmpi ne, %1, %c0_i32_0 : i32
    scf.if %2 {
      %cst_10 = arith.constant 0.000000e+00 : f32
      %12 = vector.broadcast %cst_10 : f32 to vector<8x128xf32>
      %c0_11 = arith.constant 0 : index
      %c0_12 = arith.constant 0 : index
      %13 = vector.load %arg6[%c0_11, %c0_12] : memref<8x128xf32, #tpu.memory_space<vmem>>, vector<8x128xf32>
      tpu.vector_store %arg6[%c0_11, %c0_12], %12 {strides = array<i32>} : memref<8x128xf32, #tpu.memory_space<vmem>>, vector<8x128xf32>,
    } else {
    }
    %c0 = arith.constant 0 : index
    %c0_1 = arith.constant 0 : index
    %3 = vector.load %arg6[%c0, %c0_1] : memref<8x128xf32, #tpu.memory_space<vmem>>, vector<8x128xf32>
    %c0_2 = arith.constant 0 : index
    %c0_3 = arith.constant 0 : index
    %4 = vector.load %arg2[%c0_2, %c0_3] : memref<8x1024xbf16, #tpu.memory_space<vmem>>, vector<8x1024xbf16>
    %c0_4 = arith.constant 0 : index
    %c0_5 = arith.constant 0 : index
    %5 = vector.load %arg3[%c0_4, %c0_5] : memref<1024x128xbf16, #tpu.memory_space<vmem>>, vector<1024x128xbf16>
    %cst = arith.constant dense<0.000000e+00> : vector<8x128xf32>
    %6 = tpu.matmul %4, %5, %cst {dimension_numbers = #tpu.dot_dimension_numbers<[1], [0], [0], [1], [0, 0, 1, 1], [], []>} : vector<8x1024xbf16>, vector<1024x128xbf16>, vector<8x128xf32> -> vector<8x128xf32>
    %7 = arith.addf %3, %6 : vector<8x128xf32>
    %c0_6 = arith.constant 0 : index
    %c0_7 = arith.constant 0 : index
    %8 = vector.load %arg6[%c0_6, %c0_7] : memref<8x128xf32, #tpu.memory_space<vmem>>, vector<8x128xf32>
    tpu.vector_store %arg6[%c0_6, %c0_7], %7 {strides = array<i32>} : memref<8x128xf32, #tpu.memory_space<vmem>>, vector<8x128xf32>,
    %c0_i32_8 = arith.constant 0 : i32
    %9 = arith.cmpi eq, %arg1, %c0_i32_8 : i32
    %10 = arith.extui %9 : i1 to i32
    %c0_i32_9 = arith.constant 0 : i32
    %11 = arith.cmpi ne, %10, %c0_i32_9 : i32
    scf.if %11 {
      %c0_10 = arith.constant 0 : index
      %c0_11 = arith.constant 0 : index
      %12 = vector.load %arg6[%c0_10, %c0_11] : memref<8x128xf32, #tpu.memory_space<vmem>>, vector<8x128xf32>
      %c0_12 = arith.constant 0 : index
      %c0_13 = arith.constant 0 : index
      %13 = vector.load %arg4[%c0_12, %c0_13] : memref<128x128xbf16, #tpu.memory_space<vmem>>, vector<128x128xbf16>
      %14 = arith.extf %13 : vector<128x128xbf16> to vector<128x128xf32>
      %cst_14 = arith.constant dense<0.000000e+00> : vector<8x128xf32>
      %15 = tpu.matmul %12, %14, %cst_14 {dimension_numbers = #tpu.dot_dimension_numbers<[1], [0], [0], [1], [0, 0, 1, 1], [], []>} : vector<8x128xf32>, vector<128x128xf32>, vector<8x128xf32> -> vector<8x128xf32>
      %16 = arith.mulf %12, %12 : vector<8x128xf32>
      %cst_15 = arith.constant dense<0.000000e+00> : vector<8xf32>
      %17 = vector.multi_reduction <add>, %16, %cst_15 [1] : vector<8x128xf32> to vector<8xf32>
      %18 = vector.shape_cast %17 : vector<8xf32> to vector<8x1xf32>
      %cst_16 = arith.constant 1.000000e-24 : f32
      %19 = vector.broadcast %cst_16 : f32 to vector<8x1xf32>
      %20 = arith.maximumf %18, %19 : vector<8x1xf32>
      %21 = math.rsqrt %20 : vector<8x1xf32>
      %22 = vector.broadcast %21 : vector<8x1xf32> to vector<8x128xf32>
      %23 = arith.mulf %15, %22 : vector<8x128xf32>
      %c0_17 = arith.constant 0 : index
      %c0_18 = arith.constant 0 : index
      %24 = vector.load %arg5[%c0_17, %c0_18] : memref<8x128xf32, #tpu.memory_space<vmem>>, vector<8x128xf32>
      tpu.vector_store %arg5[%c0_17, %c0_18], %23 {strides = array<i32>} : memref<8x128xf32, #tpu.memory_space<vmem>>, vector<8x128xf32>,
    } else {
    }
    return
  }
  func.func @transform_0(%arg0: i32, %arg1: i32) -> (i32, i32) {
    %c0_i32 = arith.constant 0 : i32
    return %arg0, %arg1 : i32, i32
  }
  func.func @transform_1(%arg0: i32, %arg1: i32) -> (i32, i32) {
    %c0_i32 = arith.constant 0 : i32
    %c0_i32_0 = arith.constant 0 : i32
    return %arg1, %c0_i32 : i32, i32
  }
  func.func @transform_2(%arg0: i32, %arg1: i32) -> (i32, i32) {
    %c0_i32 = arith.constant 0 : i32
    %c0_i32_0 = arith.constant 0 : i32
    %c0_i32_1 = arith.constant 0 : i32
    return %c0_i32, %c0_i32_0 : i32, i32
  }
  func.func @transform_3(%arg0: i32, %arg1: i32) -> (i32, i32) {
    %c0_i32 = arith.constant 0 : i32
    %c0_i32_0 = arith.constant 0 : i32
    return %arg0, %c0_i32 : i32, i32
  }
}

</mosaic_0001>

<bundles_post_ra>
// kernel: _forward.1
= control target key start
LH: loop header
LB: loop body
LE: loop exit
PB: predicated region body
PF: predicated region fallthrough
CT: control target
= control target key end

     0   :  { %8 = vsyncpa [#allocation4], 0  ;;  %s1211_s12 = smov [#allocation3]   ;;  %s1278_s0 = inlined_call_operand.vmem [shape: bf16[8,1024], index: 0, kind: input, shape index: {}]   ;;  %s1279_s1 = inlined_call_operand.hbm [shape: bf16[1024,128], index: 1, kind: input, shape index: {}]   ;;  %s1280_s2 = inlined_call_operand.vmem [shape: bf16[128,128], index: 2, kind: input, shape index: {}]   ;;  %s1281_s3 = inlined_call_operand.vmem [shape: f32[8,128], index: 3, kind: output, shape index: {}]  }
   0x1   :  { %s16_s13 = sshll.u32 %s1211_s12, 4  ;;  %s17_s13 = int_to_ptr.vmem [resolvable:$true] %s16_s13 }
   0x2   :  { %s1197_s14 = scalar_lea.vmem %s17_s13, 8192  ;;  %p1202_p1 = scmp.lt.s32.totalorder %s17_s13, %s17_s13 }
   0x3   :  { %p1198_p0 = scmp.ne.s32.totalorder %s17_s13, %s1197_s14  ;;  %p1203_p2 = scmp.lt.s32.totalorder %s1197_s14, %s1197_s14 }
   0x5   :  { %p1204_p3 = por %p1203_p2, %p1202_p1 }
   0x7   :  { %p1205_p4 = pnand %p1204_p3, %p1198_p0 }
   0x9   :  { %1208 = shalt.err (!%p1205_p4)
}
   0xa   :  { %s1212_s15 = smov 64   ;;  %s1213_s16 = smov 4  }
   0xb   :  { %22 = dma.hbm_to_vmem [thread:$0]  %s1279_s1, 8192, %s17_s13, [#allocation4], %s1212_s15, %s1212_s15, %s1213_s16  }
   0xc   :  { %1209 = dma.done.wait [#allocation4], 8192  }
   0xd   :  { %1210 = vsyncadd [#allocation4], 4294959104  ;;  %v1115_v0 = vld [vmem:[#allocation3 + $0x78] sm:$0xff]   ;;  %v1119_v4 = vld [vmem:[#allocation3 + $0x70] sm:$0xff]   ;;  %vm1215_vm0 = vmmov 0  }
   0xe   :  { %v1116_v1 = vld [vmem:[#allocation3 + $0xf8] sm:$0xff]   ;;  %970 = vmatprep.subr.bf16.mxu0 %v1115_v0  ;;  %v1120_v5 = vld [vmem:[#allocation3 + $0xf0] sm:$0xff]   ;;  %v1123_v8 = vld [vmem:[#allocation3 + $0x68] sm:$0xff]  }
   0xf   :  { %v1117_v2 = vld [vmem:[#allocation3 + $0x38] sm:$0xff]   ;;  %992 = vmatprep.subr.bf16.mxu1 %v1116_v1  ;;  %v1121_v6 = vld [vmem:[#allocation3 + $0x30] sm:$0xff]   ;;  %v1124_v9 = vld [vmem:[#allocation3 + $0xe8] sm:$0xff]  }
  0x10   :  { %v1118_v3 = vld [vmem:[#allocation3 + $0xb8] sm:$0xff]   ;;  %971 = vmatpush3.bf16.msra.mxu0 %v1117_v2  ;;  %v1122_v7 = vld [vmem:[#allocation3 + $0xb0] sm:$0xff]   ;;  %v1125_v10 = vld [vmem:[#allocation3 + $0x28] sm:$0xff]  }
  0x11   :  { %993 = vmatpush3.bf16.msra.mxu1 %v1118_v3  ;;  %972 = vmatprep.subr.bf16.mxu0 %v1119_v4  ;;  %v1126_v11 = vld [vmem:[#allocation3 + $0xa8] sm:$0xff]   ;;  %v1127_v12 = vld [vmem:[#allocation3 + $0x60] sm:$0xff]   ;;  %v1131_v16 = vld [vmem:[#allocation3 + $0x58] sm:$0xff]  }
  0x12   :  { %994 = vmatprep.subr.bf16.mxu1 %v1120_v5  ;;  %v1128_v13 = vld [vmem:[#allocation3 + $0xe0] sm:$0xff]   ;;  %v1132_v17 = vld [vmem:[#allocation3 + $0xd8] sm:$0xff]   ;;  %v1135_v20 = vld [vmem:[#allocation3 + $0x50] sm:$0xff]  }
  0x13   :  { %v1129_v14 = vld [vmem:[#allocation3 + $0x20] sm:$0xff]   ;;  %v1133_v18 = vld [vmem:[#allocation3 + $0x18] sm:$0xff]   ;;  %v1136_v21 = vld [vmem:[#allocation3 + $0xd0] sm:$0xff]  }
  0x14   :  { %973 = vmatpush3.bf16.msra.mxu0 %v1121_v6  ;;  %v1130_v15 = vld [vmem:[#allocation3 + $0xa0] sm:$0xff]   ;;  %v1134_v19 = vld [vmem:[#allocation3 + $0x98] sm:$0xff]   ;;  %v1137_v22 = vld [vmem:[#allocation3 + $0x10] sm:$0xff]  }
  0x15   :  { %995 = vmatpush3.bf16.msra.mxu1 %v1122_v7  ;;  %974 = vmatprep.subr.bf16.mxu0 %v1123_v8  ;;  %v1138_v23 = vld [vmem:[#allocation3 + $0x90] sm:$0xff]   ;;  %v1139_v24 = vld [vmem:[#allocation3 + $0x48] sm:$0xff]   ;;  %v1143_v28 = vld [vmem:[#allocation3 + $0x40] sm:$0xff]  }
  0x16   :  { %996 = vmatprep.subr.bf16.mxu1 %v1124_v9  ;;  %v1140_v25 = vld [vmem:[#allocation3 + $0xc8] sm:$0xff]   ;;  %v1144_v29 = vld [vmem:[#allocation3 + $0xc0] sm:$0xff]   ;;  %v1151_v38 = vld [vmem:[#allocation3 + $0x178] sm:$0xff]  }
  0x17   :  { %v1141_v26 = vld [vmem:[#allocation3 + $0x8] sm:$0xff]   ;;  %v1145_v30 = vld [vmem:[#allocation3] sm:$0xff]   ;;  %v1152_v39 = vld [vmem:[#allocation3 + $0x1f8] sm:$0xff]  }
  0x18   :  { %975 = vmatpush3.bf16.msra.mxu0 %v1125_v10  ;;  %v1142_v27 = vld [vmem:[#allocation3 + $0x88] sm:$0xff]   ;;  %v1146_v31 = vld [vmem:[#allocation3 + $0x80] sm:$0xff]   ;;  %v1153_v40 = vld [vmem:[#allocation3 + $0x138] sm:$0xff]  }
  0x19   :  { %997 = vmatpush3.bf16.msra.mxu1 %v1126_v11  ;;  %976 = vmatprep.subr.bf16.mxu0 %v1127_v12  ;;  %v35_v32 = vld [vmem:[%s1278_s0] sm:$0xff]  ;;  %v36_v33 = vld [vmem:[%s1278_s0 + $0x8] sm:$0xff]  ;;  %v1154_v41 = vld [vmem:[#allocation3 + $0x1b8] sm:$0xff]  }
  0x1a   :  { %998 = vmatprep.subr.bf16.mxu1 %v1128_v13  ;;  %v859_v34 = vcombine.low %v35_v32, %v35_v32  ;;  %v860_v35 = vcombine.high %v35_v32, %v35_v32  ;;  %v861_v36 = vcombine.low %v36_v33, %v36_v33  ;;  %v862_v37 = vcombine.high %v36_v33, %v36_v33  ;;  %v1155_v42 = vld [vmem:[#allocation3 + $0x170] sm:$0xff]   ;;  %v1159_v46 = vld [vmem:[#allocation3 + $0x168] sm:$0xff]   ;;  %v1163_v50 = vld [vmem:[#allocation3 + $0x160] sm:$0xff]  }
  0x1b   :  { %v1156_v43 = vld [vmem:[#allocation3 + $0x1f0] sm:$0xff]   ;;  %v1160_v47 = vld [vmem:[#allocation3 + $0x1e8] sm:$0xff]   ;;  %v1164_v51 = vld [vmem:[#allocation3 + $0x1e0] sm:$0xff]  }
  0x1c   :  { %977 = vmatpush3.bf16.msra.mxu0 %v1129_v14  ;;  %611 = vmatprep.mubr.bf16.mxu0 %v860_v35  ;;  %v1157_v44 = vld [vmem:[#allocation3 + $0x130] sm:$0xff]   ;;  %v1161_v48 = vld [vmem:[#allocation3 + $0x128] sm:$0xff]   ;;  %v1165_v52 = vld [vmem:[#allocation3 + $0x120] sm:$0xff]   ;;  %v1214_v14 = vmov 0.0  }
  0x1d   :  { %999 = vmatpush3.bf16.msra.mxu1 %v1130_v15  ;;  %978 = vmatprep.subr.bf16.mxu0 %v1131_v16  ;;  %v1158_v45 = vld [vmem:[#allocation3 + $0x1b0] sm:$0xff]   ;;  %v1162_v49 = vld [vmem:[#allocation3 + $0x1a8] sm:$0xff]   ;;  %v1166_v53 = vld [vmem:[#allocation3 + $0x1a0] sm:$0xff]  }
  0x1e   :  { %1000 = vmatprep.subr.bf16.mxu1 %v1132_v17  ;;  %651 = vmatprep.mubr.bf16.mxu1 %v862_v37  ;;  %v1167_v54 = vld [vmem:[#allocation3 + $0x158] sm:$0xff]   ;;  %v1171_v58 = vld [vmem:[#allocation3 + $0x150] sm:$0xff]   ;;  %v1175_v62 = vld [vmem:[#allocation3 + $0x148] sm:$0xff]  }
  0x1f   :  { %v1168_v55 = vld [vmem:[#allocation3 + $0x1d8] sm:$0xff]   ;;  %v1172_v59 = vld [vmem:[#allocation3 + $0x1d0] sm:$0xff]   ;;  %v1176_v63 = vld [vmem:[#allocation3 + $0x1c8] sm:$0xff]  }
  0x20   :  { %979 = vmatpush3.bf16.msra.mxu0 %v1133_v18  ;;  %v1169_v56 = vld [vmem:[#allocation3 + $0x118] sm:$0xff]   ;;  %v1173_v60 = vld [vmem:[#allocation3 + $0x110] sm:$0xff]   ;;  %v1177_v0 = vld [vmem:[#allocation3 + $0x108] sm:$0xff]  }
  0x21   :  { %1001 = vmatpush3.bf16.msra.mxu1 %v1134_v19  ;;  %980 = vmatprep.subr.bf16.mxu0 %v1135_v20  ;;  %v1170_v57 = vld [vmem:[#allocation3 + $0x198] sm:$0xff]   ;;  %v1174_v61 = vld [vmem:[#allocation3 + $0x190] sm:$0xff]   ;;  %v1178_v1 = vld [vmem:[#allocation3 + $0x188] sm:$0xff]  }
  0x22   :  { %1002 = vmatprep.subr.bf16.mxu1 %v1136_v21  ;;  %v1179_v2 = vld [vmem:[#allocation3 + $0x140] sm:$0xff]   ;;  %v37_v6 = vld [vmem:[%s1278_s0 + $0x10] sm:$0xff]  ;;  %v38_v9 = vld [vmem:[%s1278_s0 + $0x18] sm:$0xff] }
  0x23   :  { %v1180_v3 = vld [vmem:[#allocation3 + $0x1c0] sm:$0xff]   ;;  %v863_v7 = vcombine.low %v37_v6, %v37_v6  ;;  %v864_v8 = vcombine.high %v37_v6, %v37_v6  ;;  %v865_v10 = vcombine.low %v38_v9, %v38_v9  ;;  %v866_v11 = vcombine.high %v38_v9, %v38_v9  ;;  %v969_v12 = vld [vmem:[%s1280_s2 + $0x38] sm:$0xff]   ;;  %v968_v13 = vld [vmem:[%s1280_s2 + $0x30] sm:$0xff]  }
  0x24   :  { %981 = vmatpush3.bf16.msra.mxu0 %v1137_v22  ;;  %v1181_v4 = vld [vmem:[#allocation3 + $0x100] sm:$0xff]   ;;  %v962_v15 = vunpack.c.h.bf16 %v969_v12  ;;  %v961_v16 = vunpack.c.l.bf16 %v969_v12  ;;  %v958_v17 = vunpack.c.h.bf16 %v968_v13  ;;  %v967_v18 = vld [vmem:[%s1280_s2 + $0x28] sm:$0xff]   ;;  %v957_v19 = vunpack.c.l.bf16 %v968_v13 }
  0x25   :  { %1003 = vmatpush3.bf16.msra.mxu1 %v1138_v23  ;;  %982 = vmatprep.subr.bf16.mxu0 %v1139_v24  ;;  %v1182_v5 = vld [vmem:[#allocation3 + $0x180] sm:$0xff]   ;;  %v954_v20 = vunpack.c.h.bf16 %v967_v18  ;;  %v953_v22 = vunpack.c.l.bf16 %v967_v18  ;;  %v965_v24 = vld [vmem:[%s1280_s2 + $0x18] sm:$0xff]  }
  0x26   :  { %1004 = vmatprep.subr.bf16.mxu1 %v1140_v25  ;;  %v966_v21 = vld [vmem:[%s1280_s2 + $0x20] sm:$0xff]  }
  0x27   :  { %v950_v23 = vunpack.c.h.bf16 %v966_v21  ;;  %v949_v25 = vunpack.c.l.bf16 %v966_v21 }
  0x28   :  { %983 = vmatpush3.bf16.msra.mxu0 %v1141_v26  ;;  %v946_v26 = vunpack.c.h.bf16 %v965_v24 }
  0x29   :  { %1005 = vmatpush3.bf16.msra.mxu1 %v1142_v27  ;;  %984 = vmatprep.subr.bf16.mxu0 %v1143_v28  ;;  %v964_v27 = vld [vmem:[%s1280_s2 + $0x10] sm:$0xff]   ;;  %v945_v28 = vunpack.c.l.bf16 %v965_v24 }
  0x2a   :  { %1006 = vmatprep.subr.bf16.mxu1 %v1144_v29  ;;  %v942_v29 = vunpack.c.h.bf16 %v964_v27 }
  0x2c   :  { %985 = vmatpush3.bf16.msra.mxu0 %v1145_v30  ;;  %v941_v30 = vunpack.c.l.bf16 %v964_v27 }
  0x2d   :  { %1007 = vmatpush3.bf16.msra.mxu1 %v1146_v31  ;;  %1014 = vmatprep.subr.bf16.mxu0 %v1151_v38  ;;  %v963_v31 = vld [vmem:[%s1280_s2 + $0x8] sm:$0xff]  }
  0x2e   :  { %1036 = vmatprep.subr.bf16.mxu1 %v1152_v39  ;;  %v938_v32 = vunpack.c.h.bf16 %v963_v31  ;;  %v937_v33 = vunpack.c.l.bf16 %v963_v31 }
  0x2f   :  { %612 = vmatmul.mubr.bf16.vlgmr.msra.gmra.mxu0 %v859_v34  ;;  %v932_v34 = vld [vmem:[%s1280_s2] sm:$0xff]  }
  0x30   :  { %652 = vmatmul.mubr.bf16.vlgmr.msra.gmra.mxu1 %v861_v36  ;;  %1015 = vmatpush3.bf16.msra.mxu0 %v1153_v40  ;;  %v934_v35 = vunpack.c.h.bf16 %v932_v34  ;;  %v933_v36 = vunpack.c.l.bf16 %v932_v34 }
  0x31   :  { %1037 = vmatpush3.bf16.msra.mxu1 %v1154_v41  ;;  %1016 = vmatprep.subr.bf16.mxu0 %v1155_v42 }
  0x32   :  { %1038 = vmatprep.subr.bf16.mxu1 %v1156_v43  ;;  %691 = vmatprep.mubr.bf16.mxu0 %v864_v8 }
  0x33   :  { %731 = vmatprep.mubr.bf16.mxu1 %v866_v11 }
  0x34   :  { %1017 = vmatpush3.bf16.msra.mxu0 %v1157_v44 }
  0x35   :  { %1039 = vmatpush3.bf16.msra.mxu1 %v1158_v45  ;;  %1018 = vmatprep.subr.bf16.mxu0 %v1159_v46 }
  0x36   :  { %1040 = vmatprep.subr.bf16.mxu1 %v1160_v47 }
  0x38   :  { %1019 = vmatpush3.bf16.msra.mxu0 %v1161_v48 }
  0x39   :  { %1041 = vmatpush3.bf16.msra.mxu1 %v1162_v49  ;;  %1020 = vmatprep.subr.bf16.mxu0 %v1163_v50 }
  0x3a   :  { %1042 = vmatprep.subr.bf16.mxu1 %v1164_v51 }
  0x3c   :  { %1021 = vmatpush3.bf16.msra.mxu0 %v1165_v52 }
  0x3d   :  { %1043 = vmatpush3.bf16.msra.mxu1 %v1166_v53  ;;  %1022 = vmatprep.subr.bf16.mxu0 %v1167_v54 }
  0x3e   :  { %1044 = vmatprep.subr.bf16.mxu1 %v1168_v55 }
  0x40   :  { %1023 = vmatpush3.bf16.msra.mxu0 %v1169_v56 }
  0x41   :  { %1045 = vmatpush3.bf16.msra.mxu1 %v1170_v57  ;;  %1024 = vmatprep.subr.bf16.mxu0 %v1171_v58 }
  0x42   :  { %1046 = vmatprep.subr.bf16.mxu1 %v1172_v59 }
  0x44   :  { %1025 = vmatpush3.bf16.msra.mxu0 %v1173_v60 }
  0x45   :  { %1047 = vmatpush3.bf16.msra.mxu1 %v1174_v61  ;;  %1026 = vmatprep.subr.bf16.mxu0 %v1175_v62 }
  0x46   :  { %1048 = vmatprep.subr.bf16.mxu1 %v1176_v63 }
  0x48   :  { %1027 = vmatpush3.bf16.msra.mxu0 %v1177_v0 }
  0x49   :  { %1049 = vmatpush3.bf16.msra.mxu1 %v1178_v1  ;;  %1028 = vmatprep.subr.bf16.mxu0 %v1179_v2 }
  0x4a   :  { %1050 = vmatprep.subr.bf16.mxu1 %v1180_v3 }
  0x4c   :  { %1029 = vmatpush3.bf16.msra.mxu0 %v1181_v4 }
  0x4d   :  { %1051 = vmatpush3.bf16.msra.mxu1 %v1182_v5  ;;  %1075 = vmatprep.subr.mxu0 %v1214_v14 }
  0x4f   :  { %692 = vmatmul.mubr.bf16.vlgmr.msra.gmra.mxu0 %v863_v7 }
  0x50   :  { %732 = vmatmul.mubr.bf16.vlgmr.msra.gmra.mxu1 %v865_v10  ;;  %1076 = vmatpush3.msra.mxu0 %v962_v15 }
  0x51   :  { %1077 = vmatprep.subr.mxu0 %v1214_v14  ;;  %1107 = vmatprep.mubr.msk.f32.mxu0 %vm1215_vm0, %v1214_v14 }
  0x52   :  { %1078 = vmatpush3.msra.mxu0 %v961_v16 }
  0x53   :  { %1079 = vmatprep.subr.mxu0 %v1214_v14 }
  0x54   :  { %1080 = vmatpush3.msra.mxu0 %v958_v17 }
  0x55   :  { %1081 = vmatprep.subr.mxu0 %v1214_v14 }
  0x56   :  { %1082 = vmatpush3.msra.mxu0 %v957_v19 }
  0x57   :  { %1083 = vmatprep.subr.mxu0 %v1214_v14 }
  0x58   :  { %1084 = vmatpush3.msra.mxu0 %v954_v20 }
  0x59   :  { %1085 = vmatprep.subr.mxu0 %v1214_v14 }
  0x5a   :  { %1086 = vmatpush3.msra.mxu0 %v953_v22 }
  0x5b   :  { %1087 = vmatprep.subr.mxu0 %v1214_v14 }
  0x5c   :  { %1088 = vmatpush3.msra.mxu0 %v950_v23 }
  0x5d   :  { %1089 = vmatprep.subr.mxu0 %v1214_v14 }
  0x5e   :  { %1090 = vmatpush3.msra.mxu0 %v949_v25 }
  0x5f   :  { %1091 = vmatprep.subr.mxu0 %v1214_v14 }
  0x60   :  { %1092 = vmatpush3.msra.mxu0 %v946_v26 }
  0x61   :  { %1093 = vmatprep.subr.mxu0 %v1214_v14 }
  0x62   :  { %1094 = vmatpush3.msra.mxu0 %v945_v28 }
  0x63   :  { %1095 = vmatprep.subr.mxu0 %v1214_v14 }
  0x64   :  { %1096 = vmatpush3.msra.mxu0 %v942_v29 }
  0x65   :  { %1097 = vmatprep.subr.mxu0 %v1214_v14 }
  0x66   :  { %1098 = vmatpush3.msra.mxu0 %v941_v30 }
  0x67   :  { %1099 = vmatprep.subr.mxu0 %v1214_v14 }
  0x68   :  { %1100 = vmatpush3.msra.mxu0 %v938_v32 }
  0x69   :  { %1101 = vmatprep.subr.mxu0 %v1214_v14 }
  0x6a   :  { %1102 = vmatpush3.msra.mxu0 %v937_v33 }
  0x6b   :  { %1103 = vmatprep.subr.mxu0 %v1214_v14 }
  0x6c   :  { %1104 = vmatpush3.msra.mxu0 %v934_v35 }
  0x6d   :  { %1105 = vmatprep.subr.mxu0 %v1214_v14 }
  0x6e   :  { %1106 = vmatpush3.msra.mxu0 %v933_v36 }
  0xef   :  { %v986_v37 = vpop.f32.mrf.mxu0 }
  0xf0   :  { %v1008_v38 = vpop.f32.mrf.mxu1 }
  0xf1   :  { %v987_v39 = vpop.f32.mrf.mxu0 }
  0xf2   :  { %v1009_v40 = vpop.f32.mrf.mxu1  ;;  %v988_v45 = vadd.f32 %v987_v39, %v986_v37 }
  0xf3   :  { %v989_v41 = vpop.f32.mrf.mxu0  ;;  %v1010_v46 = vadd.f32 %v1009_v40, %v1008_v38 }
  0xf4   :  { %v1011_v42 = vpop.f32.mrf.mxu1 }
  0xf5   :  { %v990_v43 = vpop.f32.mrf.mxu0  ;;  %v654_v51 = vadd.f32 %v1010_v46, %v988_v45 }
  0xf6   :  { %v1012_v44 = vpop.f32.mrf.mxu1 }
 0x10f   :  { %v1030_v47 = vpop.f32.mrf.mxu0 }
 0x110   :  { %v1052_v48 = vpop.f32.mrf.mxu1 }
 0x111   :  { %v1031_v49 = vpop.f32.mrf.mxu0 }
 0x112   :  { %v1053_v50 = vpop.f32.mrf.mxu1  ;;  %v1032_v52 = vadd.f32 %v1031_v49, %v1030_v47 }
 0x113   :  { %v1033_v53 = vpop.f32.mrf.mxu0  ;;  %v1054_v56 = vadd.f32 %v1053_v50, %v1052_v48 }
 0x114   :  { %v1055_v54 = vpop.f32.mrf.mxu1  ;;  %v694_v55 = vadd.f32 %v1032_v52, %v654_v51 }
 0x115   :  { %v1034_v57 = vpop.f32.mrf.mxu0 }
 0x116   :  { %v1056_v58 = vpop.f32.mrf.mxu1  ;;  %v734_v59 = vadd.f32 %v1054_v56, %v694_v55 }
 0x118   :  { %1108 = vmatmul.mubr.f32.vlgmr.msra.gmra.mxu0 %v734_v59  ;;  %v847_v60 = vmul.f32 %v734_v59, %v734_v59 }
 0x11a   :  { %848 = vadd.xlane.f32.xlu0 %v847_v60 }
 0x1a3   :  { %v849_v61 = vpop.xlane.xlu0 %848 }
 0x1a4   :  { %v850_v62 = vmax.f32 %v849_v61, 1e-24 }
 0x1a6   :  { %1187 = vrsqrt.f32 %v850_v62 }
 0x1b3   :  { %v1188_v63 = vpop.eup %1187 }
 0x1d8   :  { %v843_v0 = vpop.f32.mrf.mxu0 }
 0x1d9   :  { %v852_v1 = vmul.f32 %v1188_v63, %v843_v0 }
 0x1da   :  { %v1109_v2 = vpop.f32.mrf.mxu0 }
 0x1db   :  { %853 = vst [vmem:[%s1281_s3] sm:$0xff] %v852_v1 }
 0x1dc   :  { %858 = vsyncpa [#allocation4], 1 }

</bundles_post_ra>
